<compile_context>
chip_gen: v7x
topology: tpu7x:2x2x1
jax: 0.10.0
libtpu: 0.0.40
codegen_flags: <defaults>
</compile_context>

<pallas_src>
import jax
import jax.numpy as jnp
from jax.experimental import pallas as pl
from jax.experimental.pallas import tpu as pltpu


# ----------------------------------------------------------------------------
# Pallas kernel: circular conv(k=3) + folded BN + ELU + maxpool(k=3,s=2,p=1)
# ----------------------------------------------------------------------------
def _conv_layer_kernel(x_ref, w_ref, b_ref, out_ref, pool_ref):
    Bb, L, C = x_ref.shape
    Lo = out_ref.shape[1]

    # Cast to the MXU input dtype (bf16 by default) right away: halves the
    # footprint of the taps and of the 3C-wide packed activation below.
    x = x_ref[...].astype(w_ref.dtype)                                  # (Bb, L, C)

    # --- circular 3-tap gather along the sequence axis (static slices) ------
    x_m1 = jnp.concatenate([x[:, L - 1:, :], x[:, :L - 1, :]], axis=1)  # x[(l-1) mod L]
    x_p1 = jnp.concatenate([x[:, 1:, :], x[:, :1, :]], axis=1)          # x[(l+1) mod L]
    xc = jnp.concatenate([x_m1, x, x_p1], axis=-1)                      # (Bb, L, 3C)

    # --- Conv1d(k=3, circular) + folded BatchNorm as ONE MXU matmul ---------
    y = jnp.dot(xc.reshape(Bb * L, 3 * C), w_ref[...],
                preferred_element_type=jnp.float32)
    y = y + b_ref[0]                                                    # (Bb*L, C) f32

    # --- ELU (alpha=1); clamp the dead branch so exp never overflows --------
    y = jnp.where(y > 0.0, y, jnp.exp(jnp.minimum(y, 0.0)) - 1.0)
    a = y.reshape(Bb, L, C)

    # --- MaxPool1d(k=3, stride=2, padding=1) --------------------------------
    # Stage `a` into a padded VMEM scratch (pad = -1.0; ELU output >= -1 so the
    # pad never wins) and take the max of three stride-2 sublane reads.
    # Output window j covers scratch rows {2j, 2j+1, 2j+2}
    #   = {a[2j-1] | pad,  a[2j],  a[2j+1] | pad}.
    pad_row = jnp.full((Bb, 1, C), -1.0, dtype=pool_ref.dtype)
    pool_ref[:, 0:1, :] = pad_row
    pool_ref[:, L + 1:L + 2, :] = pad_row
    pool_ref[:, 1:L + 1, :] = a
    s0 = pool_ref[:, pl.ds(0, Lo, stride=2), :]                         # a[2j-1] (pad at j=0)
    s1 = pool_ref[:, pl.ds(1, Lo, stride=2), :]                         # a[2j]
    s2 = pool_ref[:, pl.ds(2, Lo, stride=2), :]                         # a[2j+1] (pad at end)
    out_ref[...] = jnp.maximum(jnp.maximum(s0, s1), s2).astype(out_ref.dtype)


# ----------------------------------------------------------------------------
# Wrapper: host-side weight packing + BN fold, VMEM-budgeted batch tiling
# ----------------------------------------------------------------------------
def conv_layer_forward(x, params, *, batch_block=None, matmul_dtype=jnp.bfloat16):
    """ConvLayer forward (eval-mode BN). x: (B, L, C) -> (B, L_out, C)."""
    conv_w, conv_b, bn_gamma, bn_beta, bn_mean, bn_var = params
    B, L, C = x.shape
    assert conv_w.shape == (C, C, 3), conv_w.shape
    eps = 1e-5
    L_out = (L - 1) // 2 + 1          # MaxPool1d(k=3, s=2, p=1) output length

    # Fold eval-mode BatchNorm into the conv weight / bias (host, once).
    scale = bn_gamma / jnp.sqrt(bn_var + eps)                           # (C,)
    # packed taps: w_packed[k*C + ci, co] = conv_w[co, ci, k] * scale[co]
    w_packed = (jnp.transpose(conv_w, (2, 1, 0)).reshape(3 * C, C)
                * scale[None, :]).astype(matmul_dtype)
    b_fused = ((conv_b - bn_mean) * scale + bn_beta).reshape(1, C)
    b_fused = b_fused.astype(jnp.float32)                               # bias stays f32

    # ---- VMEM-budgeted batch tiling (sized per TPU generation) -------------
    try:
        vmem_cap = int(pltpu.get_tpu_info().vmem_capacity_bytes)
    except Exception:                                                   # pragma: no cover
        vmem_cap = 64 * 1024 * 1024          # v7x has the smallest VMEM (64 MiB)
    mm_b = jnp.dtype(matmul_dtype).itemsize
    io_b = jnp.dtype(x.dtype).itemsize
    # Rough per-example working set: double-buffered in/out tiles, taps +
    # 3C-wide packed activation in the matmul dtype, f32 conv/ELU temporaries,
    # and the (L+2)-row f32 pooling scratch.
    per_example = (2 * L * C * io_b + 2 * L_out * C * io_b
                   + 6 * L * C * mm_b + 2 * L * C * 4 + (L + 2) * C * 4)
    weight_bytes = 2 * (3 * C * C * mm_b + C * 4)

    if batch_block is None:
        budget = max(int(0.6 * vmem_cap) - weight_bytes, per_example)
        batch_block = max(1, min(B, budget // per_example))
        if B >= 2:
            # Keep >= 2 grid steps: shards the "parallel" batch axis across
            # v7x's two TensorCores and lets the IO pipeline overlap compute.
            batch_block = min(batch_block, -(-B // 2))
    batch_block = int(batch_block)
    nb = pl.cdiv(B, batch_block)     # uneven final block: OOB rows are masked on write

    # Raise the scoped-VMEM limit (default 16/32 MiB) toward physical VMEM.
    vmem_limit = int(min(int(0.85 * vmem_cap), 110 * 1024 * 1024))

    grid_spec = pltpu.PrefetchScalarGridSpec(
        num_scalar_prefetch=0,
        grid=(nb,),
        in_specs=[
            pl.BlockSpec((batch_block, L, C), lambda i: (i, 0, 0)),
            pl.BlockSpec((3 * C, C), lambda i: (0, 0)),   # VMEM-resident weights
            pl.BlockSpec((1, C), lambda i: (0, 0)),
        ],
        out_specs=pl.BlockSpec((batch_block, L_out, C), lambda i: (i, 0, 0)),
        scratch_shapes=[pltpu.VMEM((batch_block, L + 2, C), jnp.float32)],
    )
    return pl.pallas_call(
        _conv_layer_kernel,
        out_shape=jax.ShapeDtypeStruct((B, L_out, C), x.dtype),
        grid_spec=grid_spec,
        compiler_params=pltpu.CompilerParams(
            dimension_semantics=("parallel",),
            vmem_limit_bytes=vmem_limit),
    )(x, w_packed, b_fused)


# ----------------------------------------------------------------------------
# Pure-JAX reference (PyTorch eval-mode math).  `matmul_dtype` optionally
# mirrors the kernel's MXU input quantization (bf16 inputs, f32 accumulation)
# so the kernel can be checked tightly; f32 gives the exact PyTorch numerics.
# ----------------------------------------------------------------------------
def _conv_layer_ref(x, params, *, matmul_dtype=jnp.float32):
    conv_w, conv_b, bn_gamma, bn_beta, bn_mean, bn_var = params
    B, L, C = x.shape
    scale = bn_gamma / jnp.sqrt(bn_var + 1e-5)
    w_f = conv_w * scale[:, None, None]                 # BN folded into conv (C, C, 3)
    b_f = (conv_b - bn_mean) * scale + bn_beta
    q = lambda a: a.astype(matmul_dtype).astype(jnp.float32)
    xq, w_q = q(x), q(w_f)
    x_m1 = jnp.roll(xq, 1, axis=1)
    x_p1 = jnp.roll(xq, -1, axis=1)
    hp = jax.lax.Precision.HIGHEST
    y = (jnp.einsum('blc,oc->blo', x_m1, w_q[:, :, 0], precision=hp)
         + jnp.einsum('blc,oc->blo', xq, w_q[:, :, 1], precision=hp)
         + jnp.einsum('blc,oc->blo', x_p1, w_q[:, :, 2], precision=hp)
         + b_f[None, None, :])
    y = jnp.where(y > 0.0, y, jnp.exp(jnp.minimum(y, 0.0)) - 1.0)
    yp = jnp.pad(y, ((0, 0), (1, 1), (0, 0)), constant_values=-jnp.inf)
    L_out = (L - 1) // 2 + 1
    return jnp.stack([jnp.max(yp[:, 2 * j:2 * j + 3, :], axis=1)
                      for j in range(L_out)], axis=1)


if __name__ == "__main__":
    # Small but lane-dense test shapes: (batch, seq_len, c_in = d_model).
    B, L, C = 2, 16, 128

    key = jax.random.PRNGKey(0)
    kx, kw, kb, kg, kbe, km, kv = jax.random.split(key, 7)
    x = jax.random.normal(kx, (B, L, C), dtype=jnp.float32)

    # Conv1d weights in the PyTorch layout (out_channels, in_channels, k=3).
    conv_w = 0.1 * jax.random.normal(kw, (C, C, 3), dtype=jnp.float32)
    conv_b = 0.1 * jax.random.normal(kb, (C,), dtype=jnp.float32)
    # Non-trivial "running" BatchNorm statistics / affine params (eval mode).
    bn_gamma = 1.0 + 0.1 * jax.random.normal(kg, (C,), dtype=jnp.float32)
    bn_beta = 0.1 * jax.random.normal(kbe, (C,), dtype=jnp.float32)
    bn_mean = 0.1 * jax.random.normal(km, (C,), dtype=jnp.float32)
    bn_var = 1.0 + 0.5 * jnp.abs(jax.random.normal(kv, (C,), dtype=jnp.float32))
    params = (conv_w, conv_b, bn_gamma, bn_beta, bn_mean, bn_var)

    out = conv_layer_forward(x, params)            # default: bf16 MXU inputs, f32 acc
    jax.block_until_ready(out)

    L_out = (L - 1) // 2 + 1
    assert out.shape == (B, L_out, C), out.shape

    # Tight check vs a reference using the same bf16 input quantization.
    ref_q = _conv_layer_ref(x, params, matmul_dtype=jnp.bfloat16)
    err_q = float(jnp.max(jnp.abs(out - ref_q)))
    assert err_q < 5e-3, f"max abs err vs bf16-matched reference: {err_q}"

    # Documented (expected) small divergence of bf16 MXU inputs vs f32 numerics.
    ref_f = _conv_layer_ref(x, params, matmul_dtype=jnp.float32)
    err_f = float(jnp.max(jnp.abs(out - ref_f)))
    assert err_f < 1e-1, f"max abs err vs f32 reference: {err_f}"

    print("KERNEL_OK")
</pallas_src>

<mosaic_0001>
module attributes {stable_mosaic.version = 11 : i64} {
  func.func @_conv_layer_kernel(%arg0: i32, %arg1: memref<1x16x128xf32, #tpu.memory_space<vmem>>, %arg2: memref<384x128xbf16, #tpu.memory_space<vmem>>, %arg3: memref<1x128xf32, #tpu.memory_space<vmem>>, %arg4: memref<1x8x128xf32, #tpu.memory_space<vmem>>, %arg5: memref<1x18x128xf32, #tpu.memory_space<vmem>>) attributes {dimension_semantics = [#tpu.dimension_semantics<parallel>], iteration_bounds = array<i64: 2>, scalar_prefetch = 0 : i64, scratch_operands = 1 : i64, tpu.core_type = #tpu.core_type<tc>, window_params = [{transform_indices = @transform_0, window_bounds = array<i64: 1, 16, 128>}, {pipeline_mode = #tpu.pipeline_mode<synchronous>, transform_indices = @transform_1, window_bounds = array<i64: 384, 128>}, {pipeline_mode = #tpu.pipeline_mode<synchronous>, transform_indices = @transform_2, window_bounds = array<i64: 1, 128>}, {transform_indices = @transform_3, window_bounds = array<i64: 1, 8, 128>}]} {
    %c0 = arith.constant 0 : index
    %c0_0 = arith.constant 0 : index
    %c0_1 = arith.constant 0 : index
    %0 = vector.load %arg1[%c0, %c0_0, %c0_1] : memref<1x16x128xf32, #tpu.memory_space<vmem>>, vector<1x16x128xf32>
    %1 = arith.truncf %0 : vector<1x16x128xf32> to vector<1x16x128xbf16>
    %2 = vector.extract_strided_slice %1 {offsets = [0, 15, 0], sizes = [1, 1, 128], strides = [1, 1, 1]} : vector<1x16x128xbf16> to vector<1x1x128xbf16>
    %3 = vector.extract_strided_slice %1 {offsets = [0, 0, 0], sizes = [1, 15, 128], strides = [1, 1, 1]} : vector<1x16x128xbf16> to vector<1x15x128xbf16>
    %4 = tpu.concatenate %2, %3 in 1 : vector<1x1x128xbf16>, vector<1x15x128xbf16> -> vector<1x16x128xbf16>
    %5 = vector.extract_strided_slice %1 {offsets = [0, 1, 0], sizes = [1, 15, 128], strides = [1, 1, 1]} : vector<1x16x128xbf16> to vector<1x15x128xbf16>
    %6 = vector.extract_strided_slice %1 {offsets = [0, 0, 0], sizes = [1, 1, 128], strides = [1, 1, 1]} : vector<1x16x128xbf16> to vector<1x1x128xbf16>
    %7 = tpu.concatenate %5, %6 in 1 : vector<1x15x128xbf16>, vector<1x1x128xbf16> -> vector<1x16x128xbf16>
    %8 = tpu.concatenate %4, %1, %7 in 2 : vector<1x16x128xbf16>, vector<1x16x128xbf16>, vector<1x16x128xbf16> -> vector<1x16x384xbf16>
    %9 = vector.shape_cast %8 : vector<1x16x384xbf16> to vector<16x384xbf16>
    %c0_2 = arith.constant 0 : index
    %c0_3 = arith.constant 0 : index
    %10 = vector.load %arg2[%c0_2, %c0_3] : memref<384x128xbf16, #tpu.memory_space<vmem>>, vector<384x128xbf16>
    %cst = arith.constant dense<0.000000e+00> : vector<16x128xf32>
    %11 = tpu.matmul %9, %10, %cst {dimension_numbers = #tpu.dot_dimension_numbers<[1], [0], [0], [1], [0, 0, 1, 1], [], []>} : vector<16x384xbf16>, vector<384x128xbf16>, vector<16x128xf32> -> vector<16x128xf32>
    %c0_4 = arith.constant 0 : index
    %c0_5 = arith.constant 0 : index
    %12 = vector.load %arg3[%c0_4, %c0_5] : memref<1x128xf32, #tpu.memory_space<vmem>>, vector<1x128xf32>
    %13 = vector.shape_cast %12 : vector<1x128xf32> to vector<128xf32>
    %14 = vector.shape_cast %13 : vector<128xf32> to vector<1x128xf32>
    %15 = vector.broadcast %14 : vector<1x128xf32> to vector<16x128xf32>
    %16 = arith.addf %11, %15 : vector<16x128xf32>
    %cst_6 = arith.constant 0.000000e+00 : f32
    %17 = vector.broadcast %cst_6 : f32 to vector<16x128xf32>
    %18 = arith.cmpf ogt, %16, %17 : vector<16x128xf32>
    %cst_7 = arith.constant 0.000000e+00 : f32
    %19 = vector.broadcast %cst_7 : f32 to vector<16x128xf32>
    %20 = arith.minimumf %16, %19 : vector<16x128xf32>
    %21 = math.exp %20 : vector<16x128xf32>
    %cst_8 = arith.constant 1.000000e+00 : f32
    %22 = vector.broadcast %cst_8 : f32 to vector<16x128xf32>
    %23 = arith.subf %21, %22 : vector<16x128xf32>
    %24 = arith.select %18, %16, %23 : vector<16x128xi1>, vector<16x128xf32>
    %25 = vector.shape_cast %24 : vector<16x128xf32> to vector<1x16x128xf32>
    %cst_9 = arith.constant -1.000000e+00 : f32
    %26 = vector.broadcast %cst_9 : f32 to vector<1x1x128xf32>
    %c0_10 = arith.constant 0 : index
    %c0_11 = arith.constant 0 : index
    %c0_12 = arith.constant 0 : index
    %27 = vector.load %arg5[%c0_10, %c0_11, %c0_12] : memref<1x18x128xf32, #tpu.memory_space<vmem>>, vector<1x1x128xf32>
    tpu.vector_store %arg5[%c0_10, %c0_11, %c0_12], %26 {strides = array<i32>} : memref<1x18x128xf32, #tpu.memory_space<vmem>>, vector<1x1x128xf32>,
    %c0_13 = arith.constant 0 : index
    %c17 = arith.constant 17 : index
    %c0_14 = arith.constant 0 : index
    %28 = vector.load %arg5[%c0_13, %c17, %c0_14] : memref<1x18x128xf32, #tpu.memory_space<vmem>>, vector<1x1x128xf32>
    tpu.vector_store %arg5[%c0_13, %c17, %c0_14], %26 {strides = array<i32>} : memref<1x18x128xf32, #tpu.memory_space<vmem>>, vector<1x1x128xf32>,
    %c0_15 = arith.constant 0 : index
    %c1 = arith.constant 1 : index
    %c0_16 = arith.constant 0 : index
    %29 = vector.load %arg5[%c0_15, %c1, %c0_16] : memref<1x18x128xf32, #tpu.memory_space<vmem>>, vector<1x16x128xf32>
    tpu.vector_store %arg5[%c0_15, %c1, %c0_16], %25 {strides = array<i32>} : memref<1x18x128xf32, #tpu.memory_space<vmem>>, vector<1x16x128xf32>,
    %c0_17 = arith.constant 0 : index
    %c0_18 = arith.constant 0 : index
    %c0_19 = arith.constant 0 : index
    %30 = tpu.strided_load %arg5[%c0_17, %c0_18, %c0_19] {strides = array<i32: 1, 2, 1>} : memref<1x18x128xf32, #tpu.memory_space<vmem>>, vector<1x8x128xf32>
    %c0_20 = arith.constant 0 : index
    %c1_21 = arith.constant 1 : index
    %c0_22 = arith.constant 0 : index
    %31 = tpu.strided_load %arg5[%c0_20, %c1_21, %c0_22] {strides = array<i32: 1, 2, 1>} : memref<1x18x128xf32, #tpu.memory_space<vmem>>, vector<1x8x128xf32>
    %c0_23 = arith.constant 0 : index
    %c2 = arith.constant 2 : index
    %c0_24 = arith.constant 0 : index
    %32 = tpu.strided_load %arg5[%c0_23, %c2, %c0_24] {strides = array<i32: 1, 2, 1>} : memref<1x18x128xf32, #tpu.memory_space<vmem>>, vector<1x8x128xf32>
    %33 = arith.maximumf %30, %31 : vector<1x8x128xf32>
    %34 = arith.maximumf %33, %32 : vector<1x8x128xf32>
    %c0_25 = arith.constant 0 : index
    %c0_26 = arith.constant 0 : index
    %c0_27 = arith.constant 0 : index
    %35 = vector.load %arg4[%c0_25, %c0_26, %c0_27] : memref<1x8x128xf32, #tpu.memory_space<vmem>>, vector<1x8x128xf32>
    tpu.vector_store %arg4[%c0_25, %c0_26, %c0_27], %34 {strides = array<i32>} : memref<1x8x128xf32, #tpu.memory_space<vmem>>, vector<1x8x128xf32>,
    return
  }
  func.func @transform_0(%arg0: i32) -> (i32, i32, i32) {
    %c0_i32 = arith.constant 0 : i32
    %c0_i32_0 = arith.constant 0 : i32
    %c0_i32_1 = arith.constant 0 : i32
    return %arg0, %c0_i32, %c0_i32_0 : i32, i32, i32
  }
  func.func @transform_1(%arg0: i32) -> (i32, i32) {
    %c0_i32 = arith.constant 0 : i32
    %c0_i32_0 = arith.constant 0 : i32
    %c0_i32_1 = arith.constant 0 : i32
    return %c0_i32, %c0_i32_0 : i32, i32
  }
  func.func @transform_2(%arg0: i32) -> (i32, i32) {
    %c0_i32 = arith.constant 0 : i32
    %c0_i32_0 = arith.constant 0 : i32
    %c0_i32_1 = arith.constant 0 : i32
    return %c0_i32, %c0_i32_0 : i32, i32
  }
  func.func @transform_3(%arg0: i32) -> (i32, i32, i32) {
    %c0_i32 = arith.constant 0 : i32
    %c0_i32_0 = arith.constant 0 : i32
    %c0_i32_1 = arith.constant 0 : i32
    return %arg0, %c0_i32, %c0_i32_0 : i32, i32, i32
  }
}

</mosaic_0001>

<bundles_post_ra>
// kernel: tpu_custom_call.1
= control target key start
LH: loop header
LB: loop body
LE: loop exit
PB: predicated region body
PF: predicated region fallthrough
CT: control target
= control target key end

     0   :  { %8 = vsyncpa [#allocation4], 0  ;;  %s1190_s0 = inlined_call_operand.hbm [shape: f32[2,16,128], index: 0, kind: input, shape index: {}]   ;;  %s1191_s1 = inlined_call_operand.hbm [shape: bf16[384,128], index: 1, kind: input, shape index: {}]   ;;  %s1192_s2 = inlined_call_operand.vmem [shape: f32[1,128], index: 2, kind: input, shape index: {}]   ;;  %s1193_s3 = inlined_call_operand.hbm [shape: f32[2,8,128], index: 3, kind: output, shape index: {}]  }
   0x1   :  { %10 = vsyncpa [#allocation4 + $0x1], 0 }
   0x2   :  { %11 = vsyncpa [#allocation7], 0 }
   0x3   :  { %12 = vsyncpa [#allocation5], 0 }
   0x4   :  { %14 = vsyncpa [#allocation5 + $0x1], 0  ;;  %s974_s12 = smov 0   ;;  %s976_s13 = smov 0  }
   0x5   :  { %s978_s14 = smov 0   ;;  %s980_s15 = smov 0  }
   0x6 LB: > { %s995_s16 = sadd.s32 4294967295, %s942_s15   ;;  %s628_s17 = sadd.s32 4294967294, %s942_s15   ;;  %s942_s15 = sphi %s980_s15, %s1213_s15   ;;  %s938_s14 = sphi %s978_s14, %s1212_s14   ;;  %s934_s13 = sphi %s976_s13, %s1211_s13   ;;  %s930_s12 = sphi %s974_s12, %s1210_s12  }
   0x7   : > { %p40_p0 = scmp.ne.s32.totalorder %s934_s13, %s930_s12  ;;  %p1194_p1 = scmp.eq.s32.totalorder %s995_s16, 0 }
   0x8   : > { %p112_p3 = scmp.eq.s32.totalorder %s628_s17, 1  ;;  %p629_p5 = scmp.ge.s32.totalorder %s942_s15, 1 }
   0x9   : > { %p1004_p4 = por %p1194_p1, %p40_p0  ;;  %p119_p7 = scmp.lt.s32.totalorder %s942_s15, 3 }
   0xa   : > { %p1009_p6 = por %p112_p3, %p40_p0  ;;  %s944_s21 = smov [#allocation6]  }
   0xb   : > { %s1197_s18 = scalar_select %p1004_p4, 1, 0 }
   0xc   : > { %s1198_s19 = scalar_select %p1009_p6, 1, 0 }
   0xd   : > { %p1014_p8 = pnand %p629_p5, %p119_p7  ;;  %s131_s22 = sshll.u32 %s944_s21, 4  ;;  %s1018_s22 = int_to_ptr.vmem [resolvable:$true] %s131_s22 }
   0xe   : > { %s1030_s24 = sadd.s32 1, %s942_s15   ;;  %s27_s25 = sadd.s32 1, %s938_s14 }
   0xf   : > { %s1199_s20 = scalar_select %p1014_p8, 1, 0 }
  0x10   : > { %p730_p9 = pneg %p1014_p8  ;;  %s24_s26 = ssub.s32 %s942_s15, %s1030_s24 }
  0x11   : > { %s814_s29 = scalar_lea.hbm %s1191_s1, 3072 }
  0x12   : > { %p1025_p11 = pnand %p730_p9, %p1194_p1  ;;  %p815_p12 = scmp.ne.s32.totalorder %s1191_s1, %s814_s29 }
  0x13   : > { %p821_p5 = scmp.lt.u32.totalorder %s814_s29, %s1191_s1 }
  0x14   : > { %p816_p13 = pneg %p1025_p11 }
  0x16   : > { %p817_p0 = pnand %p816_p13, %p815_p12 }
  0x18   : > { %p818_p3 = pneg %p817_p0 }
  0x1a   : > { %p823_p7 = pnand %p821_p5, %p818_p3 }
  0x1c   : > { %826 = shalt.err (!%p823_p7)
}
  0x1d   : > { %s827_s7 = scalar_lea.vmem %s1018_s22, 3072  ;;  %p835_p2 = scmp.lt.s32.totalorder %s1018_s22, %s1018_s22 }
  0x1e   : > { %p828_p9 = scmp.ne.s32.totalorder %s1018_s22, %s827_s7  ;;  %p836_p6 = scmp.lt.s32.totalorder %s827_s7, %s827_s7 }
  0x20   : > { %p830_p10 = pnand %p828_p9, %p816_p13  ;;  %p837_p4 = por %p836_p6, %p835_p2 }
  0x22   : > { %p831_p1 = pneg %p830_p10 }
  0x24   : > { %p838_p8 = pnand %p837_p4, %p831_p1 }
  0x26   : > { %841 = shalt.err (!%p838_p8)
}
  0x27   : > { %s945_s8 = smov 64   ;;  %s946_s9 = smov 4  }
  0x28   : > { %733 = dma.hbm_to_vmem [thread:$0]  (!%p1025_p11), %s1191_s1, 3072, %s1018_s22, [#allocation7], %s945_s8, %s945_s8, %s946_s9  }
  0x29   : > { %p25_p2 = scmp.eq.s32.totalorder %s24_s26, 0  ;;  %p34_p1 = scmp.ne.s32.totalorder %s938_s14, %s934_s13 }
  0x2a   : > { %p35_p4 = scmp.eq.s32.totalorder %s942_s15, 0  ;;  %p743_p6 = scmp.lt.s32.totalorder %s942_s15, 2 }
  0x2b   : > { %s1061_s17 = scalar_select %p25_p2, %s938_s14, %s27_s25  }
  0x2c   : > { %p36_p8 = por %p35_p4, %p34_p1  ;;  %p1201_p10 = scmp.eq.s32.totalorder %s995_s16, 1 }
  0x2d   : > { %s148_s27 = sand.u32 1, %s938_s14   ;;  %s670_s28 = sshll.u32 %s942_s15, 8 }
  0x2e   : > { %p1065_p12 = por %p1201_p10, %p34_p1  ;;  %s632_s29 = sshll.u32 %s148_s27, 4 }
  0x2f   : > { %s1074_s4 = scalar_lea.hbm %s1190_s0, %s670_s28  ;;  %s152_s22 = scalar_lea.vmem [#allocation3], %s632_s29 }
  0x30   : > { %s159_s25 = sshll.u32 %s152_s22, 4  ;;  %p1076_p11 = pnand %p743_p6, %p36_p8  ;;  %s1080_s25 = int_to_ptr.vmem [resolvable:$true] %s159_s25 }
  0x31   : > { %s1082_s5 = scalar_lea.sflag [#allocation4], %s148_s27  ;;  %s842_s6 = scalar_lea.hbm %s1074_s4, 256 }
  0x32   : > { %p843_p13 = scmp.ne.s32.totalorder %s1074_s4, %s842_s6  ;;  %p844_p0 = pneg %p1076_p11 }
  0x33   : > { %s847_s9 = scalar_lea.hbm %s1190_s0, 512  ;;  %p848_p7 = scmp.lt.u32.totalorder %s1074_s4, %s1190_s0 }
  0x34   : > { %p845_p3 = pnand %p844_p0, %p843_p13  ;;  %p849_p9 = scmp.lt.u32.totalorder %s847_s9, %s842_s6 }
  0x35   : > { %p851_p1 = scmp.lt.u32.totalorder %s842_s6, %s1074_s4 }
  0x36   : > { %p846_p5 = pneg %p845_p3  ;;  %p850_p2 = por %p849_p9, %p848_p7 }
  0x38   : > { %p852_p4 = por %p851_p1, %p850_p2 }
  0x3a   : > { %p853_p6 = pnand %p852_p4, %p846_p5 }
  0x3c   : > { %856 = shalt.err (!%p853_p6)
}
  0x3d   : > { %s857_s27 = scalar_lea.vmem %s1080_s25, 256  ;;  %s947_s28 = smov [#allocation3]  }
  0x3e   : > { %p858_p8 = scmp.ne.s32.totalorder %s1080_s25, %s857_s27  ;;  %s862_s29 = sshll.u32 %s947_s28, 4  ;;  %s863_s29 = int_to_ptr.vmem [resolvable:$false] %s862_s29 }
  0x3f   : > { %s864_s23 = scalar_lea.vmem %s863_s29, 512  ;;  %p865_p3 = scmp.lt.s32.totalorder %s1080_s25, %s863_s29 }
  0x40   : > { %p860_p10 = pnand %p858_p8, %p844_p0  ;;  %p866_p7 = scmp.lt.s32.totalorder %s864_s23, %s857_s27 }
  0x42   : > { %p861_p13 = pneg %p860_p10  ;;  %p867_p9 = por %p866_p7, %p865_p3 }
  0x44   : > { %p868_p2 = pnand %p867_p9, %p861_p13 }
  0x46   : > { %871 = shalt.err (!%p868_p2)
}
  0x47   : > { %s948_s30 = smov 128   ;;  %s949_s22 = smov 8  }
  0x48   : > { %737 = dma.hbm_to_vmem [thread:$0]  (!%p1076_p11), %s1074_s4, 256, %s1080_s25, %s1082_s5, %s948_s30, %s948_s30, %s949_s22  }
  0x49   : > { %p1204_p0 = scmp.ne.s32.totalorder %s1199_s20, 0 }
  0x4a   : > { %s1113_s6 = sand.u32 (!%p1204_p0), 1, %s934_s13   ;;  %p1205_p5 = scmp.ne.s32.totalorder (!%p1204_p0), %s1197_s18, 0 }
  0x4b   : > { %171 = sbr.rel (%p1204_p0) target bundleno = 385 (0x181), region = 32  ;;  %s636_s7 = sshll.u32 (!%p1204_p0), %s1113_s6, 4 }
  0x4c   : > { %s174_s8 = scalar_lea.sflag (!%p1204_p0), [#allocation4], %s1113_s6  ;;  %s1117_s9 = scalar_lea.vmem (!%p1204_p0), [#allocation3], %s636_s7 }
  0x52   : > { %917 = dma.done.wait (%p1205_p5), %s174_s8, 256  }
  0x53   : > { %919 = vsyncadd (%p1205_p5), %s174_s8, 4294967040  ;;  %p1206_p11 = scmp.eq.s32.totalorder %s995_s16, 0 }
  0x55   : > { %921 = dma.done.wait (%p1206_p11), [#allocation7], 3072   ;;  %p1207_p1 = pmov %p1206_p11 }
  0x56   : > { %v950_v0 = vmov 0.0   ;;  %vm951_vm0 = vmmov 0   ;;  %v786_v1 = vld [vmem:[#allocation6 + $0x40] sm:$0xff]   ;;  %v789_v4 = vld [vmem:[#allocation6 + $0x48] sm:$0xff]   ;;  %v792_v7 = vld [vmem:[#allocation6 + $0x50] sm:$0xff]   ;;  %vm217_vm1 = vcmask 1040384  }
  0x57   : > { %923 = vsyncadd (%p1207_p1), [#allocation7], 4294964224  ;;  %702 = vmatprep.subr.bf16.mxu1 %v950_v0  ;;  %718 = vmatprep.mubr.msk.bf16.mxu1 %vm951_vm0, %v950_v0  ;;  %v787_v2 = vld [vmem:[#allocation6] sm:$0xff]   ;;  %v790_v5 = vld [vmem:[#allocation6 + $0x8] sm:$0xff]   ;;  %vm218_vm2 = vsmask.f32 256 }
  0x58   : > { %671 = vmatprep.subr.bf16.mxu0 %v786_v1  ;;  %v788_v3 = vld [vmem:[#allocation6 + $0x80] sm:$0xff]   ;;  %v791_v6 = vld [vmem:[#allocation6 + $0x88] sm:$0xff]   ;;  %v793_v8 = vld [vmem:[#allocation6 + $0x10] sm:$0xff]   ;;  %vm225_vm3 = vcmask 1047552   ;;  %vm226_vm4 = vsmask.f32 7424 }
  0x59   : > { %672 = vmatpush3.bf16.msra.mxu0 %v787_v2  ;;  %703 = vmatpush3.bf16.msra.mxu1 %v788_v3  ;;  %v794_v9 = vld [vmem:[#allocation6 + $0x90] sm:$0xff]   ;;  %v795_v10 = vld [vmem:[#allocation6 + $0x58] sm:$0xff]   ;;  %v798_v13 = vld [vmem:[#allocation6 + $0x60] sm:$0xff]   ;;  %v952_v36 = vmov -1.0   ;;  %s638_s4 = sshll.u32 %s1113_s6, 3  ;;  %s667_s25 = sshll.u32 %s995_s16, 7 }
  0x5a   : > { %673 = vmatprep.subr.bf16.mxu0 %v789_v4  ;;  %704 = vmatprep.subr.bf16.mxu1 %v950_v0  ;;  %v796_v11 = vld [vmem:[#allocation6 + $0x18] sm:$0xff]   ;;  %v799_v14 = vld [vmem:[#allocation6 + $0x20] sm:$0xff]   ;;  %v801_v16 = vld [vmem:[#allocation6 + $0x68] sm:$0xff]   ;;  %522 = vst [vmem:[#allocation2] sm:$0x1] %v952_v36  ;;  %s203_s26 = scalar_lea.vmem [#allocation8], %s638_s4  ;;  %s1146_s27 = scalar_lea.hbm %s1193_s3, %s667_s25 }
  0x5b   : > { %v797_v12 = vld [vmem:[#allocation6 + $0x98] sm:$0xff]   ;;  %v800_v15 = vld [vmem:[#allocation6 + $0xa0] sm:$0xff]   ;;  %v802_v17 = vld [vmem:[#allocation6 + $0x28] sm:$0xff]   ;;  %s548_s5 = sshll.u32 %s203_s26, 4  ;;  %s535_s28 = scalar_lea.sflag [#allocation5], %s1113_s6  ;;  %s1148_s5 = int_to_ptr.vmem [resolvable:$true] %s548_s5 }
  0x5c   : > { %v803_v18 = vld [vmem:[#allocation6 + $0xa8] sm:$0xff]   ;;  %v804_v19 = vld [vmem:[#allocation6 + $0x70] sm:$0xff]   ;;  %v807_v24 = vld [vmem:[#allocation6 + $0x78] sm:$0xff]   ;;  %s872_s29 = scalar_lea.vmem %s1148_s5, 128  ;;  %s953_s16 = smov [#allocation8]  }
  0x5d   : > { %674 = vmatpush3.bf16.msra.mxu0 %v790_v5  ;;  %705 = vmatpush3.bf16.msra.mxu1 %v791_v6  ;;  %v805_v20 = vld [vmem:[#allocation6 + $0x30] sm:$0xff]   ;;  %v206_v22 = vld [vmem:[%s1117_s9 + $0x8] sm:$0xff]  ;;  %vm219_vm5 = vmand %vm217_vm1, %vm218_vm2  ;;  %p873_p4 = scmp.ne.s32.totalorder %s1148_s5, %s872_s29  ;;  %s876_s23 = sshll.u32 %s953_s16, 4  ;;  %s877_s23 = int_to_ptr.vmem [resolvable:$false] %s876_s23 }
  0x5e   : > { %675 = vmatprep.subr.bf16.mxu0 %v792_v7  ;;  %706 = vmatprep.subr.bf16.mxu1 %v950_v0  ;;  %v205_v21 = vld [vmem:[%s1117_s9] sm:$0xff]  ;;  %v808_v28 = vld [vmem:[#allocation6 + $0x38] sm:$0xff]   ;;  %vm227_vm6 = vmand %vm225_vm3, %vm226_vm4  ;;  %s878_s30 = scalar_lea.vmem %s877_s23, 256  ;;  %p879_p10 = scmp.lt.s32.totalorder %s1148_s5, %s877_s23 }
  0x5f   : > { %v806_v23 = vld [vmem:[#allocation6 + $0xb0] sm:$0xff]   ;;  %v207_v25 = vpack.c.bf16 %v206_v22, %v205_v21  ;;  %v809_v29 = vld [vmem:[#allocation6 + $0xb8] sm:$0xff]   ;;  %v639_v39 = vld [vmem:[%s1192_s2] ss:$0 sm:$0xff]  ;;  %p874_p6 = pnand %p873_p4, %p1065_p12  ;;  %p880_p13 = scmp.lt.s32.totalorder %s878_s30, %s872_s29 }
  0x61   : > { %676 = vmatpush3.bf16.msra.mxu0 %v793_v8  ;;  %707 = vmatpush3.bf16.msra.mxu1 %v794_v9  ;;  %v209_v26 = vshrl.u32 %v207_v25, 16  ;;  %v213_v27 = vshll.u32 %v207_v25, 16  ;;  %p875_p8 = pneg %p874_p6  ;;  %p881_p3 = por %p880_p13, %p879_p10 }
  0x62   : > { %677 = vmatprep.subr.bf16.mxu0 %v795_v10  ;;  %708 = vmatprep.subr.bf16.mxu1 %v950_v0 }
  0x63   : > { %460 = vmatprep.mubr.bf16.mxu0 %v207_v25  ;;  %v211_v30 = vrot.slane %v209_v26, 7  ;;  %v221_v31 = vrot.slane %v213_v27, 1  ;;  %p882_p7 = pnand %p881_p3, %p875_p8 }
  0x65   : > { %678 = vmatpush3.bf16.msra.mxu0 %v796_v11  ;;  %709 = vmatpush3.bf16.msra.mxu1 %v797_v12  ;;  %v215_v32 = vor.u32 %v213_v27, %v211_v30  ;;  %v222_v33 = vor.u32 %v221_v31, %v209_v26 }
  0x66   : > { %679 = vmatprep.subr.bf16.mxu0 %v798_v13  ;;  %710 = vmatprep.subr.bf16.mxu1 %v950_v0 }
  0x67   : > { %v220_v34 = vsel %vm219_vm5, %v211_v30, %v215_v32  ;;  %v228_v35 = vsel %vm227_vm6, %v222_v33, %v221_v31 }
  0x69   : > { %680 = vmatpush3.bf16.msra.mxu0 %v799_v14  ;;  %711 = vmatpush3.bf16.msra.mxu1 %v800_v15 }
  0x6a   : > { %681 = vmatprep.subr.bf16.mxu0 %v801_v16  ;;  %712 = vmatprep.subr.bf16.mxu1 %v950_v0 }
  0x6d   : > { %682 = vmatpush3.bf16.msra.mxu0 %v802_v17  ;;  %713 = vmatpush3.bf16.msra.mxu1 %v803_v18 }
  0x6e   : > { %683 = vmatprep.subr.bf16.mxu0 %v804_v19  ;;  %714 = vmatprep.subr.bf16.mxu1 %v950_v0 }
  0x71   : > { %684 = vmatpush3.bf16.msra.mxu0 %v805_v20  ;;  %715 = vmatpush3.bf16.msra.mxu1 %v806_v23 }
  0x72   : > { %685 = vmatprep.subr.bf16.mxu0 %v807_v24  ;;  %716 = vmatprep.subr.bf16.mxu1 %v950_v0 }
  0x75   : > { %686 = vmatpush3.bf16.msra.mxu0 %v808_v28  ;;  %717 = vmatpush3.bf16.msra.mxu1 %v809_v29 }
  0x78   : > { %461 = vmatmul.mubr.bf16.vlgmr.msra.gmra.mrb[0].mxu0 %v220_v34  ;;  %719 = vmatmul.mubr.bf16.vlgmr.msra.gmra.mrb[0].mxu1 %v228_v35 }
 0x14b   : > { %v687_v37 = vpop.f32.mrb[0].mxu0  ;;  %v503_v40 = vpop.f32.mrb[0].mxu1 }
 0x14c   : > { %v688_v38 = vpop.f32.mrb[1].mxu0  ;;  %v720_v43 = vpop.f32.mrb[1].mxu1 }
 0x14d   : > { %v689_v41 = vadd.f32 %v688_v38, %v687_v37  ;;  %v690_v42 = vpop.f32.mrb[2].mxu0  ;;  %v506_v45 = vpop.f32.mrb[2].mxu1 }
 0x14e   : > { %v691_v44 = vpop.f32.mrb[3].mxu0  ;;  %v721_v48 = vpop.f32.mrb[3].mxu1 }
 0x14f   : > { %v463_v46 = vadd.f32 %v689_v41, %v639_v39  ;;  %v692_v47 = vadd.f32 %v691_v44, %v690_v42 }
 0x151   : > { %v504_v49 = vadd.f32 %v503_v40, %v463_v46  ;;  %v466_v50 = vadd.f32 %v692_v47, %v639_v39 }
 0x153   : > { %v512_v51 = vmin.f32 %v504_v49, 0.0  ;;  %v507_v52 = vadd.f32 %v506_v45, %v466_v50  ;;  %vm510_vm7 = vcmp.gt.f32.partialorder %v504_v49, 0.0 }
 0x155   : > { %v514_v53 = vmul.f32 1.442695, %v512_v51  ;;  %v513_v54 = vmin.f32 %v507_v52, 0.0  ;;  %vm511_vm8 = vcmp.gt.f32.partialorder %v507_v52, 0.0 }
 0x157   : > { %810 = vpow2.f32 %v514_v53  ;;  %v516_v55 = vmul.f32 1.442695, %v513_v54 }
 0x159   : > { %812 = vpow2.f32 %v516_v55 }
 0x161   : > { %v811_v56 = vpop.eup %810 }
 0x162   : > { %v664_v57 = vadd.f32 -1.0, %v811_v56 }
 0x163   : > { %v813_v58 = vpop.eup %812 }
 0x164   : > { %v520_v59 = vsel %vm510_vm7, %v504_v49, %v664_v57  ;;  %v665_v60 = vadd.f32 -1.0, %v813_v58 }
 0x165   : > { %524 = vst [vmem:[#allocation2 + $0x1] sm:$0xff] %v520_v59 }
 0x166   : > { %v521_v61 = vsel %vm511_vm8, %v507_v52, %v665_v60 }
 0x167   : > { %525 = vst [vmem:[#allocation2 + $0x9] sm:$0xff] %v521_v61 }
 0x16e   : > { %v526_v62 = vld [vmem:[#allocation2] ss:$2 sm:$0xff]  ;;  %v528_v63 = vld [vmem:[#allocation2 + $0x1] ss:$2 sm:$0xff] }
 0x16f   : > { %v531_v0 = vmax.f32 %v526_v62, %v528_v63  ;;  %v530_v1 = vld [vmem:[#allocation2 + $0x2] ss:$2 sm:$0xff] }
 0x171   : > { %v532_v2 = vmax.f32 %v531_v0, %v530_v1 }
 0x173   : > { %533 = vst [vmem:[%s203_s26] sm:$0xff] %v532_v2 }
 0x174   : > { %885 = shalt.err (!%p882_p7)
}
 0x175   : > { %s886_s22 = scalar_lea.hbm %s1146_s27, 128  ;;  %s890_s8 = scalar_lea.hbm %s1193_s3, 256 }
 0x176   : > { %p887_p9 = scmp.ne.s32.totalorder %s1146_s27, %s886_s22  ;;  %p891_p5 = scmp.lt.u32.totalorder %s1146_s27, %s1193_s3 }
 0x177   : > { %p892_p11 = scmp.lt.u32.totalorder %s890_s8, %s886_s22  ;;  %p894_p4 = scmp.lt.u32.totalorder %s886_s22, %s1146_s27 }
 0x178   : > { %p888_p2 = pnand %p887_p9, %p1065_p12 }
 0x179   : > { %p893_p1 = por %p892_p11, %p891_p5 }
 0x17a   : > { %p889_p0 = pneg %p888_p2 }
 0x17b   : > { %p895_p6 = por %p894_p4, %p893_p1 }
 0x17d   : > { %p896_p8 = pnand %p895_p6, %p889_p0 }
 0x17f   : > { %899 = shalt.err (!%p896_p8)
}
 0x180   : > { %728 = dma.vmem_to_hbm [thread:$0]  (%p1065_p12), %s1148_s5, 128, %s1146_s27, %s535_s28  }
 0x181 PF: > { %s560_s20 = sand.u32 1, %s930_s12   ;;  %p1208_p10 = scmp.ne.s32.totalorder %s1198_s19, 0 }
 0x182   : > { %p1209_p13 = scmp.ge.s32.totalorder %s942_s15, 2  ;;  %s561_s4 = scalar_lea.sflag [#allocation5], %s560_s20 }
 0x184   : > { %p739_p3 = pnand %p1209_p13, %p1208_p10 }
 0x186   : > { %925 = dma.done.wait (!%p739_p3), %s561_s4, 128  }
 0x187   : > { %927 = vsyncadd (!%p739_p3), %s561_s4, 4294967168  ;;  %p17_p7 = scmp.ge.s32.totalorder %s1030_s24, 4   ;;  %s1210_s12 = smov %s934_s13 }
 0x188   : > { %s1211_s13 = smov %s938_s14  ;;  %s1212_s14 = smov %s1061_s17 }
 0x189   : > { %s1213_s15 = smov %s1030_s24  ;;  %19 = sbr.rel (!%p17_p7) target bundleno = 6 (0x6), region = 83 }
 0x190   :  { %566 = vsyncpa [#allocation4], 1 }
 0x191   :  { %568 = vsyncpa [#allocation4 + $0x1], 1 }
 0x192   :  { %569 = vsyncpa [#allocation7], 1 }
 0x193   :  { %570 = vsyncpa [#allocation5], 1 }
 0x194   :  { %572 = vsyncpa [#allocation5 + $0x1], 1 }

</bundles_post_ra>
